<compile_context>
chip_gen: v7x
topology: tpu7x:2x2x1
jax: 0.10.0
libtpu: 0.0.40
codegen_flags: <defaults>
</compile_context>

<pallas_src>
import functools

import jax
import jax.numpy as jnp
import numpy as np
from jax.experimental import pallas as pl
from jax.experimental.pallas import tpu as pltpu

KH = KW = 3
BN_EPS = 1e-5
LANE = 128                       # channel tile = vreg lane width
VMEM_LIMIT = 32 * 1024 * 1024    # scoped-VMEM budget, safe on v5e/v6e/v7x


def _round_up(x, m):
    return (x + m - 1) // m * m


def _largest_divisor_leq(n, cap):
    for d in range(min(n, cap), 0, -1):
        if n % d == 0:
            return d
    return 1


# ----------------------------- pass 1 ---------------------------------------
def conv_stats_kernel(x_ref, w_ref, y_ref, sum_ref, ssq_ref, *, matmul_dtype):
    """3x3 VALID conv for one image / one channel tile + per-channel stats.

    x_ref  : (H, W, Cin)        activation (batch dim squeezed by BlockSpec)
    w_ref  : (KH*KW*Cin, Ct)    weight slab, rows in (kh, kw, cin) order
    y_ref  : (OH, OW, Ct)       f32 conv output (batch dim squeezed)
    sum_ref, ssq_ref : (1, Ct)  f32 accumulators, resident across the batch
                                grid axis (constant index_map -> "arbitrary").
    """
    OH, OW = y_ref.shape[0], y_ref.shape[1]

    @pl.when(pl.program_id(1) == 0)      # first image of this channel tile
    def _():
        sum_ref[...] = jnp.zeros_like(sum_ref)
        ssq_ref[...] = jnp.zeros_like(ssq_ref)

    w = w_ref[...].astype(matmul_dtype)  # hoisted out of the row loop

    @pl.loop(0, OH)
    def _(oh):
        # The 3 input rows feeding this output row; unfold the 3x3 taps in
        # VMEM (no HBM im2col round trip).
        rows = [x_ref[oh + kh] for kh in range(KH)]               # (W, Cin)
        taps = [rows[kh][kw:kw + OW, :]
                for kh in range(KH) for kw in range(KW)]          # (OW, Cin)
        p = jnp.concatenate(taps, axis=-1).astype(matmul_dtype)   # (OW, 9*Cin)
        yrow = jnp.dot(p, w, preferred_element_type=jnp.float32)  # (OW, Ct)
        y_ref[oh] = yrow.astype(y_ref.dtype)
        # Single-pass stats: sum and sum-of-squares (var = E[y^2] - mean^2).
        sum_ref[...] += jnp.sum(yrow, axis=0, keepdims=True)
        ssq_ref[...] += jnp.sum(yrow * yrow, axis=0, keepdims=True)


# ----------------------------- pass 2 ---------------------------------------
def bn_relu_kernel(y_ref, sum_ref, ssq_ref, gamma_ref, beta_ref, o_ref, *,
                   m_total):
    """Normalize + ReLU: per-channel scale/shift computed once per tile."""
    inv_m = 1.0 / m_total
    mean = sum_ref[...] * inv_m                                    # (1, Ct)
    var = jnp.maximum(ssq_ref[...] * inv_m - mean * mean, 0.0)
    scale = gamma_ref[...] * jax.lax.rsqrt(var + BN_EPS)
    shift = beta_ref[...] - mean * scale
    y = y_ref[...]                                                 # (TR,OW,Ct)
    o_ref[...] = jnp.maximum(y * scale + shift, 0.0).astype(o_ref.dtype)


# ----------------------------- wrapper --------------------------------------
def conv_bn_act_nhwc(x, w_hwio, gamma, beta, *, matmul_dtype=None):
    """Fused Conv(3x3, VALID) + BatchNorm2d(batch stats) + ReLU, NHWC layout."""
    N, H, W, Cin = x.shape
    kh_, kw_, cin_w, Cout = w_hwio.shape
    assert (kh_, kw_, cin_w) == (KH, KW, Cin)
    OH, OW = H - KH + 1, W - KW + 1
    Cp = _round_up(Cout, LANE)           # lane-dense padded channel count
    CT = LANE                            # channel tile
    if matmul_dtype is None:
        matmul_dtype = x.dtype

    # Weight: HWIO -> (kh*kw*cin, Cout) rows, zero-padded to Cp lanes.
    # (Done once; in a full UNet this lives with parameter preprocessing.)
    w2d = w_hwio.reshape(KH * KW * Cin, Cout).astype(matmul_dtype)
    w2d = jnp.pad(w2d, ((0, 0), (0, Cp - Cout)))
    gamma_p = jnp.pad(gamma.astype(jnp.float32).reshape(1, Cout),
                      ((0, 0), (0, Cp - Cout)), constant_values=1.0)
    beta_p = jnp.pad(beta.astype(jnp.float32).reshape(1, Cout),
                     ((0, 0), (0, Cp - Cout)))

    # --- pass 1: conv + per-channel sum / sum-of-squares --------------------
    # Grid = (channel tiles, batch).  The batch axis accumulates into the
    # resident sum/ssq blocks -> "arbitrary"; channel tiles are independent
    # -> "parallel" (shards across v7x's two TensorCores).
    # NOTE: very large first-level images would additionally need H-row
    # banding with a 2-row halo; deeper UNet levels fit per-image blocks.
    y, ysum, yssq = pl.pallas_call(
        functools.partial(conv_stats_kernel, matmul_dtype=matmul_dtype),
        out_shape=(jax.ShapeDtypeStruct((N, OH, OW, Cp), jnp.float32),
                   jax.ShapeDtypeStruct((1, Cp), jnp.float32),
                   jax.ShapeDtypeStruct((1, Cp), jnp.float32)),
        grid=(Cp // CT, N),
        in_specs=[
            pl.BlockSpec((None, H, W, Cin), lambda c, n: (n, 0, 0, 0)),
            pl.BlockSpec((KH * KW * Cin, CT), lambda c, n: (0, c)),
        ],
        out_specs=(
            pl.BlockSpec((None, OH, OW, CT), lambda c, n: (n, 0, 0, c)),
            pl.BlockSpec((1, CT), lambda c, n: (0, c)),
            pl.BlockSpec((1, CT), lambda c, n: (0, c)),
        ),
        compiler_params=pltpu.CompilerParams(
            dimension_semantics=("parallel", "arbitrary"),
            vmem_limit_bytes=VMEM_LIMIT),
    )(x, w2d)

    # --- pass 2: y * scale + shift, ReLU (lane-dense 128-wide stores) -------
    row_tile = _largest_divisor_leq(OH, 8)
    out_p = pl.pallas_call(
        functools.partial(bn_relu_kernel, m_total=float(N * OH * OW)),
        out_shape=jax.ShapeDtypeStruct((N, OH, OW, Cp), x.dtype),
        grid=(N, OH // row_tile, Cp // CT),
        in_specs=[
            pl.BlockSpec((None, row_tile, OW, CT), lambda n, r, c: (n, r, 0, c)),
            pl.BlockSpec((1, CT), lambda n, r, c: (0, c)),
            pl.BlockSpec((1, CT), lambda n, r, c: (0, c)),
            pl.BlockSpec((1, CT), lambda n, r, c: (0, c)),
            pl.BlockSpec((1, CT), lambda n, r, c: (0, c)),
        ],
        out_specs=pl.BlockSpec((None, row_tile, OW, CT),
                               lambda n, r, c: (n, r, 0, c)),
        compiler_params=pltpu.CompilerParams(
            dimension_semantics=("parallel", "parallel", "parallel"),
            vmem_limit_bytes=VMEM_LIMIT),
    )(y, ysum, yssq, gamma_p, beta_p)

    return out_p[:, :, :, :Cout]


@functools.partial(jax.jit, static_argnames=("matmul_dtype",))
def conv_bn_act(x_nchw, w_oihw, bias, gamma, beta, *, matmul_dtype=None):
    """NCHW/OIHW wrapper mirroring the PyTorch ConvBNAct module.

    The conv bias is accepted for parameter parity but not used: training-mode
    BatchNorm subtracts the per-channel batch mean, which cancels the bias
    exactly.  (If this layer were ever run with running stats / eval-mode BN,
    the bias would have to be folded back into the shift term.)
    A full UNetV2 should stay NHWC between layers and call conv_bn_act_nhwc
    directly; these transposes exist only at the module boundary.
    """
    del bias
    x = jnp.transpose(x_nchw, (0, 2, 3, 1))      # NCHW -> NHWC
    w = jnp.transpose(w_oihw, (2, 3, 1, 0))      # OIHW -> HWIO
    out = conv_bn_act_nhwc(x, w, gamma, beta, matmul_dtype=matmul_dtype)
    return jnp.transpose(out, (0, 3, 1, 2))      # NHWC -> NCHW


def reference(x_nchw, w_oihw, bias, gamma, beta):
    """Pure-JAX reference mirroring the PyTorch forward (training-mode BN)."""
    y = jax.lax.conv_general_dilated(
        x_nchw, w_oihw, window_strides=(1, 1), padding="VALID",
        dimension_numbers=("NCHW", "OIHW", "NCHW"))
    y = y + bias.reshape(1, -1, 1, 1)
    mean = jnp.mean(y, axis=(0, 2, 3), keepdims=True)
    var = jnp.mean((y - mean) ** 2, axis=(0, 2, 3), keepdims=True)
    y = (y - mean) / jnp.sqrt(var + BN_EPS)
    y = y * gamma.reshape(1, -1, 1, 1) + beta.reshape(1, -1, 1, 1)
    return jnp.maximum(y, 0.0)


if __name__ == "__main__":
    N, Cin, H, W = 2, 4, 16, 16
    Cout = 8

    key = jax.random.PRNGKey(0)
    k_x, k_w, k_b, k_g, k_be = jax.random.split(key, 5)

    x = jax.random.normal(k_x, (N, Cin, H, W), jnp.float32)
    # Deterministic synthetic params (shapes match nn.Conv2d(Cin, Cout, 3) and
    # nn.BatchNorm2d(Cout)); not a checkpoint load.
    w_oihw = jax.random.normal(k_w, (Cout, Cin, KH, KW), jnp.float32) * 0.1
    bias = jax.random.normal(k_b, (Cout,), jnp.float32) * 0.1
    gamma = 1.0 + 0.1 * jax.random.normal(k_g, (Cout,), jnp.float32)
    beta = 0.1 * jax.random.normal(k_be, (Cout,), jnp.float32)

    ref = jax.block_until_ready(reference(x, w_oihw, bias, gamma, beta))

    # f32 path (v5e and exact check): tight tolerance.
    out = jax.block_until_ready(conv_bn_act(x, w_oihw, bias, gamma, beta))
    np.testing.assert_allclose(np.asarray(out), np.asarray(ref),
                               rtol=1e-4, atol=1e-4)
    assert out.shape == (N, Cout, H - KH + 1, W - KW + 1)

    # bf16-MXU path (v6e/v7x): same kernels, matmul inputs cast to bf16 with
    # f32 accumulation and stats; looser tolerance due to bf16 rounding.
    out_bf16 = jax.block_until_ready(
        conv_bn_act(x, w_oihw, bias, gamma, beta, matmul_dtype=jnp.bfloat16))
    np.testing.assert_allclose(np.asarray(out_bf16), np.asarray(ref),
                               rtol=0, atol=8e-2)

    print("KERNEL_OK")
</pallas_src>

<mosaic_0001>
module attributes {stable_mosaic.version = 11 : i64} {
  func.func @conv_stats_kernel(%arg0: i32, %arg1: i32, %arg2: memref<1x16x16x4xf32, #tpu.memory_space<vmem>>, %arg3: memref<36x128xf32, #tpu.memory_space<vmem>>, %arg4: memref<1x14x14x128xf32, #tpu.memory_space<vmem>>, %arg5: memref<1x128xf32, #tpu.memory_space<vmem>>, %arg6: memref<1x128xf32, #tpu.memory_space<vmem>>) attributes {dimension_semantics = [#tpu.dimension_semantics<parallel>, #tpu.dimension_semantics<arbitrary>], iteration_bounds = array<i64: 1, 2>, scalar_prefetch = 0 : i64, scratch_operands = 0 : i64, tpu.core_type = #tpu.core_type<tc>, window_params = [{transform_indices = @transform_0, window_bounds = array<i64: 1, 16, 16, 4>}, {transform_indices = @transform_1, window_bounds = array<i64: 36, 128>}, {transform_indices = @transform_2, window_bounds = array<i64: 1, 14, 14, 128>}, {transform_indices = @transform_3, window_bounds = array<i64: 1, 128>}, {transform_indices = @transform_4, window_bounds = array<i64: 1, 128>}]} {
    %c0_i32 = arith.constant 0 : i32
    %0 = arith.cmpi eq, %arg1, %c0_i32 : i32
    %1 = arith.extui %0 : i1 to i32
    %c0_i32_0 = arith.constant 0 : i32
    %2 = arith.cmpi ne, %1, %c0_i32_0 : i32
    scf.if %2 {
      %cst = arith.constant 0.000000e+00 : f32
      %5 = vector.broadcast %cst : f32 to vector<1x128xf32>
      %c0_4 = arith.constant 0 : index
      %c0_5 = arith.constant 0 : index
      %6 = vector.load %arg5[%c0_4, %c0_5] : memref<1x128xf32, #tpu.memory_space<vmem>>, vector<1x128xf32>
      tpu.vector_store %arg5[%c0_4, %c0_5], %5 {strides = array<i32>} : memref<1x128xf32, #tpu.memory_space<vmem>>, vector<1x128xf32>,
      %cst_6 = arith.constant 0.000000e+00 : f32
      %7 = vector.broadcast %cst_6 : f32 to vector<1x128xf32>
      %c0_7 = arith.constant 0 : index
      %c0_8 = arith.constant 0 : index
      %8 = vector.load %arg6[%c0_7, %c0_8] : memref<1x128xf32, #tpu.memory_space<vmem>>, vector<1x128xf32>
      tpu.vector_store %arg6[%c0_7, %c0_8], %7 {strides = array<i32>} : memref<1x128xf32, #tpu.memory_space<vmem>>, vector<1x128xf32>,
    } else {
    }
    %c0 = arith.constant 0 : index
    %c0_1 = arith.constant 0 : index
    %3 = vector.load %arg3[%c0, %c0_1] : memref<36x128xf32, #tpu.memory_space<vmem>>, vector<36x128xf32>
    %c0_i32_2 = arith.constant 0 : i32
    %c14_i32 = arith.constant 14 : i32
    %4 = arith.addi %c0_i32_2, %c14_i32 : i32
    %c1_i32 = arith.constant 1 : i32
    scf.for %arg7 = %c0_i32_2 to %4 step %c1_i32  : i32 {
      %c1_i32_4 = arith.constant 1 : i32
      %5 = arith.muli %arg7, %c1_i32_4 : i32
      %c0_i32_5 = arith.constant 0 : i32
      %6 = arith.addi %c0_i32_5, %5 : i32
      %c0_i32_6 = arith.constant 0 : i32
      %7 = arith.addi %6, %c0_i32_6 : i32
      %c0_7 = arith.constant 0 : index
      %8 = arith.index_cast %7 : i32 to index
      %c0_8 = arith.constant 0 : index
      %c0_9 = arith.constant 0 : index
      %9 = vector.load %arg2[%c0_7, %8, %c0_8, %c0_9] : memref<1x16x16x4xf32, #tpu.memory_space<vmem>>, vector<1x1x16x4xf32>
      %10 = vector.shape_cast %9 : vector<1x1x16x4xf32> to vector<16x4xf32>
      %c1_i32_10 = arith.constant 1 : i32
      %11 = arith.addi %6, %c1_i32_10 : i32
      %c0_11 = arith.constant 0 : index
      %12 = arith.index_cast %11 : i32 to index
      %c0_12 = arith.constant 0 : index
      %c0_13 = arith.constant 0 : index
      %13 = vector.load %arg2[%c0_11, %12, %c0_12, %c0_13] : memref<1x16x16x4xf32, #tpu.memory_space<vmem>>, vector<1x1x16x4xf32>
      %14 = vector.shape_cast %13 : vector<1x1x16x4xf32> to vector<16x4xf32>
      %c2_i32 = arith.constant 2 : i32
      %15 = arith.addi %6, %c2_i32 : i32
      %c0_14 = arith.constant 0 : index
      %16 = arith.index_cast %15 : i32 to index
      %c0_15 = arith.constant 0 : index
      %c0_16 = arith.constant 0 : index
      %17 = vector.load %arg2[%c0_14, %16, %c0_15, %c0_16] : memref<1x16x16x4xf32, #tpu.memory_space<vmem>>, vector<1x1x16x4xf32>
      %18 = vector.shape_cast %17 : vector<1x1x16x4xf32> to vector<16x4xf32>
      %19 = vector.extract_strided_slice %10 {offsets = [0, 0], sizes = [14, 4], strides = [1, 1]} : vector<16x4xf32> to vector<14x4xf32>
      %20 = vector.extract_strided_slice %10 {offsets = [1, 0], sizes = [14, 4], strides = [1, 1]} : vector<16x4xf32> to vector<14x4xf32>
      %21 = vector.extract_strided_slice %10 {offsets = [2, 0], sizes = [14, 4], strides = [1, 1]} : vector<16x4xf32> to vector<14x4xf32>
      %22 = vector.extract_strided_slice %14 {offsets = [0, 0], sizes = [14, 4], strides = [1, 1]} : vector<16x4xf32> to vector<14x4xf32>
      %23 = vector.extract_strided_slice %14 {offsets = [1, 0], sizes = [14, 4], strides = [1, 1]} : vector<16x4xf32> to vector<14x4xf32>
      %24 = vector.extract_strided_slice %14 {offsets = [2, 0], sizes = [14, 4], strides = [1, 1]} : vector<16x4xf32> to vector<14x4xf32>
      %25 = vector.extract_strided_slice %18 {offsets = [0, 0], sizes = [14, 4], strides = [1, 1]} : vector<16x4xf32> to vector<14x4xf32>
      %26 = vector.extract_strided_slice %18 {offsets = [1, 0], sizes = [14, 4], strides = [1, 1]} : vector<16x4xf32> to vector<14x4xf32>
      %27 = vector.extract_strided_slice %18 {offsets = [2, 0], sizes = [14, 4], strides = [1, 1]} : vector<16x4xf32> to vector<14x4xf32>
      %28 = tpu.concatenate %19, %20, %21, %22, %23, %24, %25, %26, %27 in 1 : vector<14x4xf32>, vector<14x4xf32>, vector<14x4xf32>, vector<14x4xf32>, vector<14x4xf32>, vector<14x4xf32>, vector<14x4xf32>, vector<14x4xf32>, vector<14x4xf32> -> vector<14x36xf32>
      %cst = arith.constant dense<0.000000e+00> : vector<14x128xf32>
      %29 = tpu.matmul %28, %3, %cst {dimension_numbers = #tpu.dot_dimension_numbers<[1], [0], [0], [1], [0, 0, 1, 1], [], []>} : vector<14x36xf32>, vector<36x128xf32>, vector<14x128xf32> -> vector<14x128xf32>
      %c0_17 = arith.constant 0 : index
      %30 = arith.index_cast %6 : i32 to index
      %c0_18 = arith.constant 0 : index
      %c0_19 = arith.constant 0 : index
      %31 = vector.load %arg4[%c0_17, %30, %c0_18, %c0_19] : memref<1x14x14x128xf32, #tpu.memory_space<vmem>>, vector<1x1x14x128xf32>
      %32 = vector.shape_cast %31 : vector<1x1x14x128xf32> to vector<14x128xf32>
      %33 = vector.shape_cast %29 : vector<14x128xf32> to vector<1x1x14x128xf32>
      tpu.vector_store %arg4[%c0_17, %30, %c0_18, %c0_19], %33 {strides = array<i32>} : memref<1x14x14x128xf32, #tpu.memory_space<vmem>>, vector<1x1x14x128xf32>,
      %c0_20 = arith.constant 0 : index
      %c0_21 = arith.constant 0 : index
      %34 = vector.load %arg5[%c0_20, %c0_21] : memref<1x128xf32, #tpu.memory_space<vmem>>, vector<1x128xf32>
      %cst_22 = arith.constant dense<0.000000e+00> : vector<128xf32>
      %35 = vector.multi_reduction <add>, %29, %cst_22 [0] : vector<14x128xf32> to vector<128xf32>
      %36 = vector.shape_cast %35 : vector<128xf32> to vector<1x128xf32>
      %37 = arith.addf %34, %36 : vector<1x128xf32>
      %c0_23 = arith.constant 0 : index
      %c0_24 = arith.constant 0 : index
      %38 = vector.load %arg5[%c0_23, %c0_24] : memref<1x128xf32, #tpu.memory_space<vmem>>, vector<1x128xf32>
      tpu.vector_store %arg5[%c0_23, %c0_24], %37 {strides = array<i32>} : memref<1x128xf32, #tpu.memory_space<vmem>>, vector<1x128xf32>,
      %c0_25 = arith.constant 0 : index
      %c0_26 = arith.constant 0 : index
      %39 = vector.load %arg6[%c0_25, %c0_26] : memref<1x128xf32, #tpu.memory_space<vmem>>, vector<1x128xf32>
      %40 = arith.mulf %29, %29 : vector<14x128xf32>
      %cst_27 = arith.constant dense<0.000000e+00> : vector<128xf32>
      %41 = vector.multi_reduction <add>, %40, %cst_27 [0] : vector<14x128xf32> to vector<128xf32>
      %42 = vector.shape_cast %41 : vector<128xf32> to vector<1x128xf32>
      %43 = arith.addf %39, %42 : vector<1x128xf32>
      %c0_28 = arith.constant 0 : index
      %c0_29 = arith.constant 0 : index
      %44 = vector.load %arg6[%c0_28, %c0_29] : memref<1x128xf32, #tpu.memory_space<vmem>>, vector<1x128xf32>
      tpu.vector_store %arg6[%c0_28, %c0_29], %43 {strides = array<i32>} : memref<1x128xf32, #tpu.memory_space<vmem>>, vector<1x128xf32>,
    }
    %c14_i32_3 = arith.constant 14 : i32
    return
  }
  func.func @transform_0(%arg0: i32, %arg1: i32) -> (i32, i32, i32, i32) {
    %c0_i32 = arith.constant 0 : i32
    %c0_i32_0 = arith.constant 0 : i32
    %c0_i32_1 = arith.constant 0 : i32
    %c0_i32_2 = arith.constant 0 : i32
    return %arg1, %c0_i32, %c0_i32_0, %c0_i32_1 : i32, i32, i32, i32
  }
  func.func @transform_1(%arg0: i32, %arg1: i32) -> (i32, i32) {
    %c0_i32 = arith.constant 0 : i32
    %c0_i32_0 = arith.constant 0 : i32
    return %c0_i32, %arg0 : i32, i32
  }
  func.func @transform_2(%arg0: i32, %arg1: i32) -> (i32, i32, i32, i32) {
    %c0_i32 = arith.constant 0 : i32
    %c0_i32_0 = arith.constant 0 : i32
    %c0_i32_1 = arith.constant 0 : i32
    return %arg1, %c0_i32, %c0_i32_0, %arg0 : i32, i32, i32, i32
  }
  func.func @transform_3(%arg0: i32, %arg1: i32) -> (i32, i32) {
    %c0_i32 = arith.constant 0 : i32
    %c0_i32_0 = arith.constant 0 : i32
    return %c0_i32, %arg0 : i32, i32
  }
  func.func @transform_4(%arg0: i32, %arg1: i32) -> (i32, i32) {
    %c0_i32 = arith.constant 0 : i32
    %c0_i32_0 = arith.constant 0 : i32
    return %c0_i32, %arg0 : i32, i32
  }
}

module attributes {stable_mosaic.version = 11 : i64} {
  func.func @bn_relu_kernel(%arg0: i32, %arg1: i32, %arg2: i32, %arg3: memref<1x7x14x128xf32, #tpu.memory_space<vmem>>, %arg4: memref<1x128xf32, #tpu.memory_space<vmem>>, %arg5: memref<1x128xf32, #tpu.memory_space<vmem>>, %arg6: memref<1x128xf32, #tpu.memory_space<vmem>>, %arg7: memref<1x128xf32, #tpu.memory_space<vmem>>, %arg8: memref<1x7x14x128xf32, #tpu.memory_space<vmem>>) attributes {dimension_semantics = [#tpu.dimension_semantics<parallel>, #tpu.dimension_semantics<parallel>, #tpu.dimension_semantics<parallel>], iteration_bounds = array<i64: 2, 2, 1>, scalar_prefetch = 0 : i64, scratch_operands = 0 : i64, tpu.core_type = #tpu.core_type<tc>, window_params = [{transform_indices = @transform_0, window_bounds = array<i64: 1, 7, 14, 128>}, {transform_indices = @transform_1, window_bounds = array<i64: 1, 128>}, {transform_indices = @transform_2, window_bounds = array<i64: 1, 128>}, {transform_indices = @transform_3, window_bounds = array<i64: 1, 128>}, {transform_indices = @transform_4, window_bounds = array<i64: 1, 128>}, {transform_indices = @transform_5, window_bounds = array<i64: 1, 7, 14, 128>}]} {
    %c0 = arith.constant 0 : index
    %c0_0 = arith.constant 0 : index
    %0 = vector.load %arg4[%c0, %c0_0] : memref<1x128xf32, #tpu.memory_space<vmem>>, vector<1x128xf32>
    %cst = arith.constant 0.00255102036 : f32
    %1 = vector.broadcast %cst : f32 to vector<1x128xf32>
    %2 = arith.mulf %0, %1 : vector<1x128xf32>
    %c0_1 = arith.constant 0 : index
    %c0_2 = arith.constant 0 : index
    %3 = vector.load %arg5[%c0_1, %c0_2] : memref<1x128xf32, #tpu.memory_space<vmem>>, vector<1x128xf32>
    %cst_3 = arith.constant 0.00255102036 : f32
    %4 = vector.broadcast %cst_3 : f32 to vector<1x128xf32>
    %5 = arith.mulf %3, %4 : vector<1x128xf32>
    %6 = arith.mulf %2, %2 : vector<1x128xf32>
    %7 = arith.subf %5, %6 : vector<1x128xf32>
    %cst_4 = arith.constant 0.000000e+00 : f32
    %8 = vector.broadcast %cst_4 : f32 to vector<1x128xf32>
    %9 = arith.maximumf %7, %8 : vector<1x128xf32>
    %c0_5 = arith.constant 0 : index
    %c0_6 = arith.constant 0 : index
    %10 = vector.load %arg6[%c0_5, %c0_6] : memref<1x128xf32, #tpu.memory_space<vmem>>, vector<1x128xf32>
    %cst_7 = arith.constant 9.99999974E-6 : f32
    %11 = vector.broadcast %cst_7 : f32 to vector<1x128xf32>
    %12 = arith.addf %9, %11 : vector<1x128xf32>
    %13 = math.rsqrt %12 : vector<1x128xf32>
    %14 = arith.mulf %10, %13 : vector<1x128xf32>
    %c0_8 = arith.constant 0 : index
    %c0_9 = arith.constant 0 : index
    %15 = vector.load %arg7[%c0_8, %c0_9] : memref<1x128xf32, #tpu.memory_space<vmem>>, vector<1x128xf32>
    %16 = arith.mulf %2, %14 : vector<1x128xf32>
    %17 = arith.subf %15, %16 : vector<1x128xf32>
    %c0_10 = arith.constant 0 : index
    %c0_11 = arith.constant 0 : index
    %c0_12 = arith.constant 0 : index
    %c0_13 = arith.constant 0 : index
    %18 = vector.load %arg3[%c0_10, %c0_11, %c0_12, %c0_13] : memref<1x7x14x128xf32, #tpu.memory_space<vmem>>, vector<1x7x14x128xf32>
    %19 = vector.shape_cast %18 : vector<1x7x14x128xf32> to vector<7x14x128xf32>
    %20 = vector.shape_cast %14 : vector<1x128xf32> to vector<1x1x128xf32>
    %21 = vector.broadcast %20 : vector<1x1x128xf32> to vector<7x14x128xf32>
    %22 = arith.mulf %19, %21 : vector<7x14x128xf32>
    %23 = vector.shape_cast %17 : vector<1x128xf32> to vector<1x1x128xf32>
    %24 = vector.broadcast %23 : vector<1x1x128xf32> to vector<7x14x128xf32>
    %25 = arith.addf %22, %24 : vector<7x14x128xf32>
    %cst_14 = arith.constant 0.000000e+00 : f32
    %26 = vector.broadcast %cst_14 : f32 to vector<7x14x128xf32>
    %27 = arith.maximumf %25, %26 : vector<7x14x128xf32>
    %c0_15 = arith.constant 0 : index
    %c0_16 = arith.constant 0 : index
    %c0_17 = arith.constant 0 : index
    %c0_18 = arith.constant 0 : index
    %28 = vector.load %arg8[%c0_15, %c0_16, %c0_17, %c0_18] : memref<1x7x14x128xf32, #tpu.memory_space<vmem>>, vector<1x7x14x128xf32>
    %29 = vector.shape_cast %28 : vector<1x7x14x128xf32> to vector<7x14x128xf32>
    %30 = vector.shape_cast %27 : vector<7x14x128xf32> to vector<1x7x14x128xf32>
    tpu.vector_store %arg8[%c0_15, %c0_16, %c0_17, %c0_18], %30 {strides = array<i32>} : memref<1x7x14x128xf32, #tpu.memory_space<vmem>>, vector<1x7x14x128xf32>,
    return
  }
  func.func @transform_0(%arg0: i32, %arg1: i32, %arg2: i32) -> (i32, i32, i32, i32) {
    %c0_i32 = arith.constant 0 : i32
    %c0_i32_0 = arith.constant 0 : i32
    return %arg0, %arg1, %c0_i32, %arg2 : i32, i32, i32, i32
  }
  func.func @transform_1(%arg0: i32, %arg1: i32, %arg2: i32) -> (i32, i32) {
    %c0_i32 = arith.constant 0 : i32
    %c0_i32_0 = arith.constant 0 : i32
    return %c0_i32, %arg2 : i32, i32
  }
  func.func @transform_2(%arg0: i32, %arg1: i32, %arg2: i32) -> (i32, i32) {
    %c0_i32 = arith.constant 0 : i32
    %c0_i32_0 = arith.constant 0 : i32
    return %c0_i32, %arg2 : i32, i32
  }
  func.func @transform_3(%arg0: i32, %arg1: i32, %arg2: i32) -> (i32, i32) {
    %c0_i32 = arith.constant 0 : i32
    %c0_i32_0 = arith.constant 0 : i32
    return %c0_i32, %arg2 : i32, i32
  }
  func.func @transform_4(%arg0: i32, %arg1: i32, %arg2: i32) -> (i32, i32) {
    %c0_i32 = arith.constant 0 : i32
    %c0_i32_0 = arith.constant 0 : i32
    return %c0_i32, %arg2 : i32, i32
  }
  func.func @transform_5(%arg0: i32, %arg1: i32, %arg2: i32) -> (i32, i32, i32, i32) {
    %c0_i32 = arith.constant 0 : i32
    %c0_i32_0 = arith.constant 0 : i32
    return %arg0, %arg1, %c0_i32, %arg2 : i32, i32, i32, i32
  }
}

</mosaic_0001>

<bundles_post_ra>
// kernel: conv_bn_act.3
= control target key start
LH: loop header
LB: loop body
LE: loop exit
PB: predicated region body
PF: predicated region fallthrough
CT: control target
= control target key end

     0   :  { %s738_s18 = smov 0   ;;  %s740_s19 = smov 0   ;;  %s824_s0 = inlined_call_operand.vmem [shape: f32[2,14,14,128], index: 0, kind: input, shape index: {}]   ;;  %s825_s1 = inlined_call_operand.vmem [shape: f32[1,128], index: 1, kind: input, shape index: {}]   ;;  %s826_s2 = inlined_call_operand.vmem [shape: f32[1,128], index: 2, kind: input, shape index: {}]   ;;  %s827_s3 = inlined_call_operand.vmem [shape: f32[1,128], index: 3, kind: input, shape index: {}]   ;;  %s828_s4 = inlined_call_operand.vmem [shape: f32[1,128], index: 4, kind: input, shape index: {}]   ;;  %s829_s5 = inlined_call_operand.vmem [shape: f32[2,14,14,128], index: 5, kind: output, shape index: {}]  }
   0x1   :  { %s742_s20 = smov 0   ;;  %s744_s21 = smov 0  }
   0x2   :  { %s746_s22 = smov 0  }
   0x3 LB: > { %s30_s23 = sadd.s32 1, %s698_s20  ;;  %s34_s24 = sadd.s32 1, %s702_s21  ;;  %s706_s22 = sphi %s746_s22, %s15_s22   ;;  %s702_s21 = sphi %s744_s21, %s833_s21   ;;  %s698_s20 = sphi %s742_s20, %s832_s20   ;;  %s694_s19 = sphi %s740_s19, %s831_s19   ;;  %s690_s18 = sphi %s738_s18, %s830_s18  }
   0x4   : > { %p32_p0 = scmp.ge.s32.totalorder %s30_s23, 2  ;;  %p618_p1 = scmp.ge.s32.totalorder %s706_s22, 1 }
   0x5   : > { %p255_p2 = scmp.lt.s32.totalorder %s706_s22, 5 }
   0x6   : > { %s835_s23 = smov (%p32_p0, %s30_s23), 0  ;;  %s837_s24 = smov (!%p32_p0, %s34_s24), %s702_s21 }
   0x7   : > { %p256_p3 = pnand %p618_p1, %p255_p2  ;;  %p36_p4 = scmp.ge.s32.totalorder %s837_s24, 2 }
   0x8   : > { %s311_s25 = smul.u32 (!%p256_p3), 7, %s690_s18  ;;  %v351_v0 = vld [vmem:[%s825_s1] sm:$0x1] (!%p256_p3)  ;;  %p312_p5 = scmp.lt.s32.totalorder (!%p256_p3), %s694_s19, 1  ;;  %v380_v8 = vlaneseq (!%p256_p3) }
   0x9   : > { %s839_s24 = smov (%p36_p4, %s837_s24), 0  ;;  %259 = sbr.rel (%p256_p3) target bundleno = 50 (0x32), region = 40 }
   0xa   : > { %v353_v1 = vld [vmem:[%s826_s2] sm:$0x1] (!%p256_p3)  ;;  %v352_v2 = vmul.f32 (!%p256_p3), 0.0025510204, %v351_v0  ;;  %p314_p6 = scmp.lt.s32.totalorder (!%p256_p3), %s311_s25, 13  ;;  %v381_v9 = vshrl.u32 (!%p256_p3), %v380_v8, 7 }
   0xb   : > { %v354_v3 = vmul.f32 (!%p256_p3), 0.0025510204, %v353_v1  ;;  %v358_v10 = vld [vmem:[%s827_s3] sm:$0x1] (!%p256_p3) }
   0xc   : > { %v355_v4 = vmul.f32 (!%p256_p3), %v352_v2, %v352_v2  ;;  %v382_v11 = vsub.s32 (!%p256_p3), 0, %v381_v9  ;;  %v362_v14 = vld [vmem:[%s828_s4] sm:$0x1] (!%p256_p3) }
   0xe   : > { %v356_v5 = vsub.f32 (!%p256_p3), %v354_v3, %v355_v4 }
  0x10   : > { %s841_s19 = smov (!%p312_p5, %s694_s19), 1  ;;  %s843_s25 = smov (!%p314_p6, %s311_s25), 13  ;;  %v357_v6 = vmax.f32 %v356_v5, 0.0 }
  0x11   : > { %s625_s30 = smul.u32 28, %s841_s19  ;;  %s619_s6 = sshll.u32 %s843_s25, 1 }
  0x12   : > { %v359_v7 = vadd.f32 1e-05, %v357_v6 }
  0x13   : > { %s774_s7 = sadd.s32 %s625_s30, %s619_s6 }
  0x14   : > { %666 = vrsqrt.f32 %v359_v7  ;;  %s620_s8 = sshll.u32 %s774_s7, 3 }
  0x15   : > { %s323_s11 = scalar_lea.vmem %s824_s0, %s620_s8  ;;  %s793_s18 = scalar_lea.vmem %s829_s5, %s620_s8 }
  0x16   : > { %v365_v15 = vld [vmem:[%s323_s11] sm:$0xff]  ;;  %v366_v16 = vld [vmem:[%s323_s11 + $0x8] sm:$0x3f]  ;;  %v367_v17 = vld [vmem:[%s323_s11 + $0x10] sm:$0xff] }
  0x17   : > { %v368_v18 = vld [vmem:[%s323_s11 + $0x18] sm:$0x3f]  ;;  %v369_v19 = vld [vmem:[%s323_s11 + $0x20] sm:$0xff]  ;;  %v370_v22 = vld [vmem:[%s323_s11 + $0x28] sm:$0x3f] }
  0x18   : > { %v371_v23 = vld [vmem:[%s323_s11 + $0x30] sm:$0xff]  ;;  %v372_v24 = vld [vmem:[%s323_s11 + $0x38] sm:$0x3f]  ;;  %v373_v25 = vld [vmem:[%s323_s11 + $0x40] sm:$0xff] }
  0x19   : > { %v374_v26 = vld [vmem:[%s323_s11 + $0x48] sm:$0x3f]  ;;  %v375_v27 = vld [vmem:[%s323_s11 + $0x50] sm:$0xff]  ;;  %v376_v32 = vld [vmem:[%s323_s11 + $0x58] sm:$0x3f] }
  0x1a   : > { %v377_v33 = vld [vmem:[%s323_s11 + $0x60] sm:$0xff]  ;;  %v378_v34 = vld [vmem:[%s323_s11 + $0x68] sm:$0x3f] }
  0x1e   : > { %v667_v12 = vpop.eup %666 }
  0x1f   : > { %v361_v13 = vmul.f32 %v667_v12, %v358_v10 }
  0x21   : > { %v363_v20 = vmul.f32 %v361_v13, %v352_v2  ;;  %v383_v21 = vrot.slane %v361_v13, %v382_v11 }
  0x23   : > { %v364_v28 = vsub.f32 %v362_v14, %v363_v20  ;;  %v385_v29 = vmul.f32 %v383_v21, %v365_v15  ;;  %v386_v30 = vmul.f32 %v383_v21, %v366_v16  ;;  %v387_v31 = vmul.f32 %v383_v21, %v367_v17 }
  0x24   : > { %v388_v35 = vmul.f32 %v383_v21, %v368_v18  ;;  %v389_v36 = vmul.f32 %v383_v21, %v369_v19  ;;  %v390_v37 = vmul.f32 %v383_v21, %v370_v22  ;;  %v391_v38 = vmul.f32 %v383_v21, %v371_v23 }
  0x25   : > { %v403_v39 = vrot.slane %v364_v28, %v382_v11  ;;  %v392_v40 = vmul.f32 %v383_v21, %v372_v24  ;;  %v393_v41 = vmul.f32 %v383_v21, %v373_v25  ;;  %v394_v42 = vmul.f32 %v383_v21, %v374_v26 }
  0x26   : > { %v395_v43 = vmul.f32 %v383_v21, %v375_v27  ;;  %v396_v44 = vmul.f32 %v383_v21, %v376_v32  ;;  %v397_v45 = vmul.f32 %v383_v21, %v377_v33  ;;  %v398_v46 = vmul.f32 %v383_v21, %v378_v34 }
  0x27   : > { %v405_v47 = vadd.f32 %v403_v39, %v385_v29  ;;  %v406_v48 = vadd.f32 %v403_v39, %v386_v30  ;;  %v407_v49 = vadd.f32 %v403_v39, %v387_v31  ;;  %v408_v50 = vadd.f32 %v403_v39, %v388_v35 }
  0x28   : > { %v409_v51 = vadd.f32 %v403_v39, %v389_v36  ;;  %v410_v52 = vadd.f32 %v403_v39, %v390_v37  ;;  %v411_v53 = vadd.f32 %v403_v39, %v391_v38  ;;  %v412_v54 = vadd.f32 %v403_v39, %v392_v40 }
  0x29   : > { %v419_v55 = vmax.f32 %v405_v47, 0.0  ;;  %v420_v56 = vmax.f32 %v406_v48, 0.0  ;;  %v421_v57 = vmax.f32 %v407_v49, 0.0  ;;  %v422_v58 = vmax.f32 %v408_v50, 0.0 }
  0x2a   : > { %v423_v59 = vmax.f32 %v409_v51, 0.0  ;;  %v424_v60 = vmax.f32 %v410_v52, 0.0  ;;  %v425_v61 = vmax.f32 %v411_v53, 0.0  ;;  %v426_v62 = vmax.f32 %v412_v54, 0.0 }
  0x2b   : > { %433 = vst [vmem:[%s793_s18] sm:$0xff] %v419_v55  ;;  %434 = vst [vmem:[%s793_s18 + $0x8] sm:$0x3f] %v420_v56  ;;  %v413_v63 = vadd.f32 %v403_v39, %v393_v41  ;;  %v414_v0 = vadd.f32 %v403_v39, %v394_v42  ;;  %v415_v1 = vadd.f32 %v403_v39, %v395_v43 }
  0x2c   : > { %435 = vst [vmem:[%s793_s18 + $0x10] sm:$0xff] %v421_v57  ;;  %436 = vst [vmem:[%s793_s18 + $0x18] sm:$0x3f] %v422_v58  ;;  %v416_v2 = vadd.f32 %v403_v39, %v396_v44  ;;  %v417_v3 = vadd.f32 %v403_v39, %v397_v45  ;;  %v418_v4 = vadd.f32 %v403_v39, %v398_v46 }
  0x2d   : > { %437 = vst [vmem:[%s793_s18 + $0x20] sm:$0xff] %v423_v59  ;;  %438 = vst [vmem:[%s793_s18 + $0x28] sm:$0x3f] %v424_v60  ;;  %v427_v5 = vmax.f32 %v413_v63, 0.0  ;;  %v428_v6 = vmax.f32 %v414_v0, 0.0  ;;  %v429_v7 = vmax.f32 %v415_v1, 0.0 }
  0x2e   : > { %439 = vst [vmem:[%s793_s18 + $0x30] sm:$0xff] %v425_v61  ;;  %440 = vst [vmem:[%s793_s18 + $0x38] sm:$0x3f] %v426_v62  ;;  %v430_v8 = vmax.f32 %v416_v2, 0.0  ;;  %v431_v9 = vmax.f32 %v417_v3, 0.0  ;;  %v432_v10 = vmax.f32 %v418_v4, 0.0 }
  0x2f   : > { %441 = vst [vmem:[%s793_s18 + $0x40] sm:$0xff] %v427_v5  ;;  %442 = vst [vmem:[%s793_s18 + $0x48] sm:$0x3f] %v428_v6 }
  0x30   : > { %443 = vst [vmem:[%s793_s18 + $0x50] sm:$0xff] %v429_v7  ;;  %444 = vst [vmem:[%s793_s18 + $0x58] sm:$0x3f] %v430_v8 }
  0x31   : > { %445 = vst [vmem:[%s793_s18 + $0x60] sm:$0xff] %v431_v9  ;;  %446 = vst [vmem:[%s793_s18 + $0x68] sm:$0x3f] %v432_v10 }
  0x32 PF: > { %s15_s22 = sadd.s32 1, %s706_s22   ;;  %s830_s18 = smov %s698_s20 }
  0x33   : > { %p12_p7 = scmp.ge.s32.totalorder %s15_s22, 6   ;;  %s831_s19 = smov %s702_s21 }
  0x34   : > { %s832_s20 = smov %s835_s23  ;;  %s833_s21 = smov %s839_s24 }
  0x35   :  { %14 = sbr.rel (!%p12_p7) target bundleno = 3 (0x3), region = 82 }

// kernel: conv_bn_act.2
= control target key start
LH: loop header
LB: loop body
LE: loop exit
PB: predicated region body
PF: predicated region fallthrough
CT: control target
= control target key end

     0   :  { %s807_s15 = smov 0   ;;  %s809_s16 = smov 0   ;;  %s934_s0 = inlined_call_operand.vmem [shape: f32[2,16,16,4], index: 0, kind: input, shape index: {}]   ;;  %s935_s1 = inlined_call_operand.vmem [shape: f32[36,128], index: 1, kind: input, shape index: {}]   ;;  %s936_s2 = inlined_call_operand.vmem [shape: f32[2,14,14,128], index: 2, kind: output, shape index: {0}]   ;;  %s937_s3 = inlined_call_operand.vmem [shape: f32[1,128], index: 3, kind: output, shape index: {1}]   ;;  %s938_s4 = inlined_call_operand.vmem [shape: f32[1,128], index: 4, kind: output, shape index: {2}]  }
   0x1   :  { %s811_s17 = smov 0  }
   0x2 LB: > { %s24_s18 = sadd.s32 1, %s763_s16  ;;  %p651_p0 = scmp.ge.s32.totalorder %s767_s17, 1  ;;  %s767_s17 = sphi %s811_s17, %s15_s17   ;;  %s763_s16 = sphi %s809_s16, %s940_s16   ;;  %s759_s15 = sphi %s807_s15, %s939_s15  }
   0x3   : > { %p25_p1 = scmp.ge.s32.totalorder %s24_s18, 2  ;;  %p190_p2 = scmp.lt.s32.totalorder %s767_s17, 3 }
   0x5   : > { %s942_s18 = smov (%p25_p1, %s24_s18), 0  ;;  %p191_p3 = pnand %p651_p0, %p190_p2 }
   0x6   : > { %p229_p4 = scmp.lt.s32.totalorder (!%p191_p3), %s759_s15, 1  ;;  %p655_p5 = scmp.ne.s32.totalorder (!%p191_p3), %s759_s15, 0 }
   0x7   : > { %194 = sbr.rel (%p191_p3) target bundleno = 406 (0x196), region = 28 }
   0xe   : > { %s230_s19 = scalar_select %p229_p4, %s759_s15, 1 }
   0xf   : > { %255 = sbr.rel (%p655_p5) target bundleno = 22 (0x16), region = 32  ;;  %v773_v0 = vmov (!%p655_p5), 0.0  }
  0x10   : > { %s670_s20 = sshll.u32 %s230_s19, 8  ;;  %s699_s21 = smul.u32 224, %s230_s19  ;;  %256 = vst [vmem:[%s937_s3] sm:$0x1] (!%p655_p5), %v773_v0  ;;  %257 = vst [vmem:[%s938_s4] sm:$0x1] (!%p655_p5), %v773_v0 }
  0x11   : > { %s828_s24 = scalar_lea.vmem %s934_s0, %s670_s20 }
  0x12   : > { %s833_s27 = scalar_lea.vmem %s936_s2, %s699_s21 }
  0x16 PF: > { %v844_v1 = vld [vmem:[%s935_s1] sm:$0xff]  ;;  %v849_v2 = vld [vmem:[%s935_s1 + $0x8] sm:$0xff]  ;;  %v854_v3 = vld [vmem:[%s935_s1 + $0x10] sm:$0xff]  ;;  %s866_s19 = smov 0  }
  0x17   : > { %v859_v4 = vld [vmem:[%s935_s1 + $0x18] sm:$0xff]  ;;  %v864_v5 = vld [vmem:[%s935_s1 + $0x20] sm:$0xf] }
  0x18 LB: >> { %s656_s20 = sshll.u32 %s771_s19, 4  ;;  %s774_s22 = smov 8   ;;  %vm295_vm0 = vcmask 1045504   ;;  %vm285_vm1 = vcmask 1046528   ;;  %v691_v18 = vpack.c.bf16 %v849_v2, %v844_v1  ;;  %v695_v22 = vpack.c.bf16 %v859_v4, %v854_v3  ;;  %s771_s19 = sphi %s866_s19, %s268_s19  }
  0x19   : >> { %s875_s21 = scalar_lea.vmem %s828_s24, %s656_s20  ;;  %s775_s23 = smov 4   ;;  %vm388_vm2 = vcmask 1043456   ;;  %vm357_vm3 = vcmask 31744   ;;  %vm360_vm4 = vcmask 64512   ;;  %vm363_vm5 = vcmask 97280  }
  0x1a   : >> { %v878_v6 = vld [vmem:[%s875_s21 + $0x8] sm:$0xff]  ;;  %v883_v9 = vld [vmem:[%s875_s21] sm:$0xff]  ;;  %v659_v10 = vld [vmem:[%s875_s21 + $0x18] sm:$0xff]  ;;  %s776_s25 = smov 12   ;;  %692 = vmatprep.subr.bf16.mxu0 %v691_v18  ;;  %s777_s26 = smov 16   ;;  %vm366_vm6 = vcmask 130048  }
  0x1b   : >> { %v297_v7 = vrot.slane %v878_v6, 2  ;;  %v287_v8 = vrot.slane %v878_v6, 1  ;;  %v658_v11 = vld [vmem:[%s875_s21 + $0x10] sm:$0xff]  ;;  %v296_v12 = vrot.slane %v883_v9, 2  ;;  %v286_v13 = vrot.slane %v883_v9, 1  ;;  %694 = vmatpush3.bf16.msra.mxu0 %v691_v18  ;;  %v662_v24 = vld [vmem:[%s875_s21 + $0x28] sm:$0xff]  ;;  %s467_s6 = scalar_lea.vmem %s833_s27, %s656_s20 }
  0x1c   : >> { %v313_v14 = vrot.slane %v658_v11, 1  ;;  %v314_v17 = vrot.slane %v659_v10, 1  ;;  %v322_v19 = vrot.slane %v658_v11, 2  ;;  %v323_v21 = vrot.slane %v659_v10, 2  ;;  %696 = vmatprep.subr.bf16.mxu0 %v695_v22  ;;  %v661_v25 = vld [vmem:[%s875_s21 + $0x20] sm:$0xff]  ;;  %s778_s28 = smov 20  }
  0x1d   : >> { %301 = vrot.lane.b32.xlu1 %v297_v7, %s774_s22  ;;  %291 = vrot.lane.b32.xlu0 %v287_v8, %s775_s23  ;;  %v298_v15 = vsel %vm295_vm0, %v296_v12, %v297_v7  ;;  %v288_v16 = vsel %vm285_vm1, %v286_v13, %v287_v8  ;;  %v339_v26 = vrot.slane %v661_v25, 1  ;;  %v340_v27 = vrot.slane %v662_v24, 1  ;;  %s779_s29 = smov 24   ;;  %s780_s30 = smov 28  }
  0x1e   : >> { %v315_v20 = vsel %vm285_vm1, %v313_v14, %v314_v17  ;;  %v324_v23 = vsel %vm295_vm0, %v322_v19, %v323_v21  ;;  %v348_v28 = vrot.slane %v661_v25, 2  ;;  %v349_v30 = vrot.slane %v662_v24, 2  ;;  %s781_s5 = smov 32   ;;  %s268_s19 = sadd.s32 1, %s771_s19  }
  0x1f   : >> { %698 = vmatpush3.bf16.msra.mxu0 %v695_v22  ;;  %v341_v29 = vsel %vm285_vm1, %v339_v26, %v340_v27  ;;  %vm369_vm7 = vcmask 162816   ;;  %vm372_vm8 = vcmask 195584   ;;  %vm375_vm9 = vcmask 228352   ;;  %v470_v22 = vld [vmem:[%s937_s3] sm:$0x1]  ;;  %p265_p6 = scmp.ge.s32.totalorder %s268_s19, 14  }
  0x20   : >> { %686 = vmatprep.subr.msk.mxu0 %vm388_vm2, %v864_v5  ;;  %v350_v31 = vsel %vm295_vm0, %v348_v28, %v349_v30  ;;  %vm378_vm10 = vcmask 261120   ;;  %vm381_vm11 = vcmask 293888  }
  0x21   : >> { %309 = vrot.lane.b32.xlu1 %v659_v10, %s776_s25  ;;  %307 = vrot.lane.b32.xlu0 %v658_v11, %s776_s25 }
  0x23   : >> { %687 = vmatpush3.msk.msra.mxu0 %vm388_vm2, %v864_v5 }
  0x25   : >> { %299 = vrot.lane.b32.xlu1 %v298_v15, %s774_s22  ;;  %289 = vrot.lane.b32.xlu0 %v288_v16, %s775_s23 }
  0x29   : >> { %318 = vrot.lane.b32.xlu1 %v314_v17, %s777_s26  ;;  %316 = vrot.lane.b32.xlu0 %v315_v20, %s777_s26 }
  0x2d   : >> { %327 = vrot.lane.b32.xlu1 %v323_v21, %s778_s28  ;;  %325 = vrot.lane.b32.xlu0 %v324_v23, %s778_s28 }
  0x31   : >> { %335 = vrot.lane.b32.xlu1 %v662_v24, %s779_s29  ;;  %333 = vrot.lane.b32.xlu0 %v661_v25, %s779_s29  ;;  %v481_v25 = vld [vmem:[%s938_s4] sm:$0x1] }
  0x35   : >> { %344 = vrot.lane.b32.xlu1 %v340_v27, %s780_s30  ;;  %342 = vrot.lane.b32.xlu0 %v341_v29, %s780_s30 }
  0x39   : >> { %353 = vrot.lane.b32.xlu1 %v349_v30, %s781_s5  ;;  %351 = vrot.lane.b32.xlu0 %v350_v31, %s781_s5 }
  0x8f   : >> { %v302_v32 = vpop.permute.xlu1 %301  ;;  %v292_v33 = vpop.permute.xlu0 %291 }
  0x90   : >> { %v359_v44 = vsel %vm357_vm3, %v878_v6, %v292_v33 }
  0x91   : >> { %v362_v48 = vsel %vm360_vm4, %v359_v44, %v302_v32 }
  0x93   : >> { %v310_v34 = vpop.permute.xlu1 %309  ;;  %v308_v35 = vpop.permute.xlu0 %307 }
  0x94   : >> { %v365_v49 = vsel %vm363_vm5, %v362_v48, %v310_v34 }
  0x97   : >> { %v300_v36 = vpop.permute.xlu1 %299  ;;  %v290_v37 = vpop.permute.xlu0 %289 }
  0x98   : >> { %v358_v40 = vsel %vm357_vm3, %v883_v9, %v290_v37 }
  0x99   : >> { %v361_v43 = vsel %vm360_vm4, %v358_v40, %v300_v36 }
  0x9a   : >> { %v364_v47 = vsel %vm363_vm5, %v361_v43, %v308_v35 }
  0x9b   : >> { %v319_v38 = vpop.permute.xlu1 %318  ;;  %v317_v39 = vpop.permute.xlu0 %316 }
  0x9c   : >> { %v368_v52 = vsel %vm366_vm6, %v365_v49, %v319_v38  ;;  %v367_v53 = vsel %vm366_vm6, %v364_v47, %v317_v39 }
  0x9f   : >> { %v328_v41 = vpop.permute.xlu1 %327  ;;  %v326_v42 = vpop.permute.xlu0 %325 }
  0xa0   : >> { %v371_v54 = vsel %vm369_vm7, %v368_v52, %v328_v41  ;;  %v370_v55 = vsel %vm369_vm7, %v367_v53, %v326_v42 }
  0xa3   : >> { %v336_v45 = vpop.permute.xlu1 %335  ;;  %v334_v46 = vpop.permute.xlu0 %333 }
  0xa4   : >> { %v374_v56 = vsel %vm372_vm8, %v371_v54, %v336_v45  ;;  %v373_v57 = vsel %vm372_vm8, %v370_v55, %v334_v46 }
  0xa7   : >> { %v345_v50 = vpop.permute.xlu1 %344  ;;  %v343_v51 = vpop.permute.xlu0 %342 }
  0xa8   : >> { %v377_v58 = vsel %vm375_vm9, %v374_v56, %v345_v50  ;;  %v376_v59 = vsel %vm375_vm9, %v373_v57, %v343_v51 }
  0xab   : >> { %v354_v60 = vpop.permute.xlu1 %353  ;;  %v352_v61 = vpop.permute.xlu0 %351 }
  0xac   : >> { %v380_v62 = vsel %vm378_vm10, %v377_v58, %v354_v60  ;;  %v379_v63 = vsel %vm378_vm10, %v376_v59, %v352_v61 }
  0xad   : >> { %688 = vmatprep.mubr.msk.f32.mxu0 %vm381_vm11, %v379_v63 }
  0xae   : >> { %689 = vmatmul.mubr.msk.f32.vlgmr.msra.gmra.mrb[0].mxu0 %vm381_vm11, %v380_v62 }
 0x181   : >> { %v690_v0 = vpop.f32.mrb[0].mxu0 }
 0x182   : >> { %v483_v6 = vmul.f32 %v690_v0, %v690_v0  ;;  %v458_v7 = vpop.f32.mrb[1].mxu0  ;;  %469 = vst [vmem:[%s467_s6 + $0x8] sm:$0x3f] %v690_v0  ;;  %v471_v8 = vsel %vm295_vm0, %v690_v0, 0.0 }
 0x183   : >> { %468 = vst [vmem:[%s467_s6] sm:$0xff] %v458_v7  ;;  %v472_v9 = vadd.f32 %v471_v8, %v458_v7  ;;  %v482_v10 = vmul.f32 %v458_v7, %v458_v7 }
 0x184   : >> { %v484_v11 = vsel %vm295_vm0, %v483_v6, 0.0 }
 0x185   : >> { %v473_v12 = vrot.slane %v472_v9, 4  ;;  %v485_v13 = vadd.f32 %v484_v11, %v482_v10 }
 0x187   : >> { %v474_v14 = vadd.f32 %v473_v12, %v472_v9  ;;  %v486_v15 = vrot.slane %v485_v13, 4 }
 0x189   : >> { %v475_v16 = vrot.slane %v474_v14, 2  ;;  %v487_v17 = vadd.f32 %v486_v15, %v485_v13 }
 0x18b   : >> { %v476_v18 = vadd.f32 %v475_v16, %v474_v14  ;;  %v488_v19 = vrot.slane %v487_v17, 2 }
 0x18d   : >> { %v477_v20 = vrot.slane %v476_v18, 1  ;;  %v489_v21 = vadd.f32 %v488_v19, %v487_v17 }
 0x18f   : >> { %v478_v23 = vadd.f32 %v477_v20, %v476_v18  ;;  %v490_v24 = vrot.slane %v489_v21, 1  ;;  %267 = sbr.rel (!%p265_p6) target bundleno = 24 (0x18), region = 100 }
 0x191   : >> { %v479_v26 = vadd.f32 %v478_v23, %v470_v22  ;;  %v491_v27 = vadd.f32 %v490_v24, %v489_v21 }
 0x193   : >> { %480 = vst [vmem:[%s937_s3] sm:$0x1] %v479_v26  ;;  %v492_v28 = vadd.f32 %v491_v27, %v481_v25 }
 0x195   : >> { %493 = vst [vmem:[%s938_s4] sm:$0x1] %v492_v28 }
 0x196 PF: > { %s15_s17 = sadd.s32 1, %s767_s17   ;;  %s939_s15 = smov %s763_s16 }
 0x197   : > { %p12_p7 = scmp.ge.s32.totalorder %s15_s17, 4   ;;  %s940_s16 = smov %s942_s18 }
 0x199   :  { %14 = sbr.rel (!%p12_p7) target bundleno = 2 (0x2), region = 111 }

</bundles_post_ra>
